<compile_context>
chip_gen: v7x
topology: tpu7x:2x2x1
jax: 0.10.0
libtpu: 0.0.40
codegen_flags: <defaults>
</compile_context>

<pallas_src>
import jax
import jax.numpy as jnp
from jax.experimental import pallas as pl
from jax.experimental.pallas import tpu as pltpu

_LANE = 128
_MAX_TB = 1024
_MAX_TK = 2048


def _round_up(x, m):
    return (x + m - 1) // m * m


def _logreg_kernel(x_ref, w_ref, b_ref, o_ref):
    # x_ref: (TB, TK) bf16   w_ref: (TK, TN) bf16
    # b_ref: (1, TN)  f32    o_ref: (TB, TN) f32  (doubles as the accumulator)
    k = pl.program_id(2)

    @pl.when(k == 0)
    def _():
        o_ref[...] = jnp.zeros_like(o_ref)

    o_ref[...] += jnp.dot(
        x_ref[...], w_ref[...], preferred_element_type=jnp.float32
    )

    @pl.when(k == pl.num_programs(2) - 1)
    def _():
        # Fused bias add + sigmoid epilogue (EUP slot, essentially free).
        o_ref[...] = jax.nn.sigmoid(o_ref[...] + b_ref[...])


def prepare_params(weight, bias):
    """One-time parameter prep (outside the hot path).

    weight: [D_out, D_in] (PyTorch nn.Linear layout), bias: [D_out].
    Returns:
      w_t_padded: [K_pad, N_pad] bf16  (transposed, zero-padded, MXU-native)
      bias_padded: [1, N_pad] f32
    with K_pad, N_pad multiples of 128 (lane-dense output, 128-aligned K).
    """
    d_out, d_in = weight.shape
    n_pad = _round_up(d_out, _LANE)
    k_pad = _round_up(d_in, _LANE)
    w_t = jnp.zeros((k_pad, n_pad), jnp.bfloat16)
    w_t = w_t.at[:d_in, :d_out].set(weight.T.astype(jnp.bfloat16))
    b2d = jnp.zeros((1, n_pad), jnp.float32).at[:, :d_out].set(
        bias.astype(jnp.float32)
    )
    return w_t, b2d


def prepare_input(x, k_pad):
    """Cast activations to bf16 (MXU-native, halves HBM read) and zero-pad K."""
    _, k = x.shape
    x_bf = x.astype(jnp.bfloat16)
    if k < k_pad:
        x_bf = jnp.pad(x_bf, ((0, 0), (0, k_pad - k)))
    return x_bf


def _pick_tiles(B, K_pad, N_pad):
    # N tile: 128 keeps MXU columns full on all chips (v5e MXU is 4x128x128)
    # and N_pad is always a multiple of 128.
    tn = _LANE

    # K tile: K_pad is a multiple of 128; keep it whole when small so the k
    # grid axis collapses, otherwise pick the largest 128-multiple divisor
    # <= _MAX_TK (exact accumulation, bounded VMEM footprint).
    if K_pad <= _MAX_TK:
        tk = K_pad
    else:
        tk = _MAX_TK
        while K_pad % tk != 0:
            tk -= _LANE

    # Batch tile: full batch when small; for large B cap at 1024 and make sure
    # there are at least 2 blocks so v7x's two TensorCores both get work.
    if B <= 512:
        tb = B
    else:
        tb = min(_MAX_TB, _round_up((B + 1) // 2, 8))

    return tb, tn, tk


def logistic_regression_padded(x_bf, w_t_padded, bias_padded):
    """Hot path. x_bf: [B, K_pad] bf16; returns padded [B, N_pad] f32.

    Columns >= d_out of the result are sigmoid(0) = 0.5 and must be ignored.
    """
    B, K_pad = x_bf.shape
    K2, N_pad = w_t_padded.shape
    assert K_pad == K2

    tb, tn, tk = _pick_tiles(B, K_pad, N_pad)
    grid = (pl.cdiv(B, tb), N_pad // tn, K_pad // tk)

    return pl.pallas_call(
        _logreg_kernel,
        out_shape=jax.ShapeDtypeStruct((B, N_pad), jnp.float32),
        grid=grid,
        in_specs=[
            pl.BlockSpec((tb, tk), lambda i, j, k: (i, k)),
            pl.BlockSpec((tk, tn), lambda i, j, k: (k, j)),
            pl.BlockSpec((1, tn), lambda i, j, k: (0, j)),
        ],
        out_specs=pl.BlockSpec((tb, tn), lambda i, j, k: (i, j)),
        compiler_params=pltpu.CompilerParams(
            dimension_semantics=("parallel", "parallel", "arbitrary"),
            # Safe on v7x (64 MiB physical); tiles above fit in ~10 MiB worst case.
            vmem_limit_bytes=48 * 1024 * 1024,
        ),
    )(x_bf, w_t_padded, bias_padded)


def logistic_regression(x, w_t_padded, bias_padded, d_out):
    """Convenience wrapper: sigmoid(x @ W^T + b) with exact shape [B, d_out].

    The [:, :d_out] slice is an extra XLA copy pass; performance-critical
    callers should consume the padded buffer from logistic_regression_padded.
    """
    k_pad = w_t_padded.shape[0]
    x_bf = prepare_input(x, k_pad)
    y_pad = logistic_regression_padded(x_bf, w_t_padded, bias_padded)
    return y_pad[:, :d_out]


if __name__ == "__main__":
    # Small shapes consistent with the module: input_dim=32, output_dim=16, batch=8.
    batch, input_dim, output_dim = 8, 32, 16

    key = jax.random.PRNGKey(0)
    kx, kw, kb = jax.random.split(key, 3)

    x = jax.random.normal(kx, (batch, input_dim), dtype=jnp.float32)
    # Deterministic param init mimicking torch.nn.Linear's uniform(-1/sqrt(fan_in), ...).
    bound = 1.0 / jnp.sqrt(jnp.float32(input_dim))
    weight = jax.random.uniform(kw, (output_dim, input_dim), jnp.float32, -bound, bound)
    bias = jax.random.uniform(kb, (output_dim,), jnp.float32, -bound, bound)

    # One-time parameter preparation (transpose + pad + bf16 cast), off the hot path.
    w_t_padded, bias_padded = prepare_params(weight, bias)
    jax.block_until_ready((w_t_padded, bias_padded))

    y = logistic_regression(x, w_t_padded, bias_padded, output_dim)
    jax.block_until_ready(y)

    # Reference with the same bf16-operand / f32-accumulate numerics as the MXU path.
    z_ref = jnp.dot(
        x.astype(jnp.bfloat16),
        weight.T.astype(jnp.bfloat16),
        preferred_element_type=jnp.float32,
    ) + bias
    y_ref = jax.nn.sigmoid(z_ref)
    y_ref_f32 = jax.nn.sigmoid(x @ weight.T + bias)

    assert y.shape == (batch, output_dim)
    assert jnp.allclose(y, y_ref, atol=1e-5, rtol=1e-5)
    assert jnp.allclose(y, y_ref_f32, atol=2e-2, rtol=2e-2)  # bf16-vs-f32 sanity

    print("KERNEL_OK")
</pallas_src>

<mosaic_0001>
module attributes {stable_mosaic.version = 11 : i64} {
  func.func @_logreg_kernel(%arg0: i32, %arg1: i32, %arg2: i32, %arg3: memref<8x128xbf16, #tpu.memory_space<vmem>>, %arg4: memref<128x128xbf16, #tpu.memory_space<vmem>>, %arg5: memref<1x128xf32, #tpu.memory_space<vmem>>, %arg6: memref<8x128xf32, #tpu.memory_space<vmem>>) attributes {dimension_semantics = [#tpu.dimension_semantics<parallel>, #tpu.dimension_semantics<parallel>, #tpu.dimension_semantics<arbitrary>], iteration_bounds = array<i64: 1, 1, 1>, scalar_prefetch = 0 : i64, scratch_operands = 0 : i64, tpu.core_type = #tpu.core_type<tc>, window_params = [{transform_indices = @transform_0, window_bounds = array<i64: 8, 128>}, {transform_indices = @transform_1, window_bounds = array<i64: 128, 128>}, {transform_indices = @transform_2, window_bounds = array<i64: 1, 128>}, {transform_indices = @transform_3, window_bounds = array<i64: 8, 128>}]} {
    %c0_i32 = arith.constant 0 : i32
    %0 = arith.cmpi eq, %arg2, %c0_i32 : i32
    %1 = arith.extui %0 : i1 to i32
    %c0_i32_0 = arith.constant 0 : i32
    %2 = arith.cmpi ne, %1, %c0_i32_0 : i32
    scf.if %2 {
      %cst_10 = arith.constant 0.000000e+00 : f32
      %12 = vector.broadcast %cst_10 : f32 to vector<8x128xf32>
      %c0_11 = arith.constant 0 : index
      %c0_12 = arith.constant 0 : index
      %13 = vector.load %arg6[%c0_11, %c0_12] : memref<8x128xf32, #tpu.memory_space<vmem>>, vector<8x128xf32>
      tpu.vector_store %arg6[%c0_11, %c0_12], %12 {strides = array<i32>} : memref<8x128xf32, #tpu.memory_space<vmem>>, vector<8x128xf32>,
    } else {
    }
    %c0 = arith.constant 0 : index
    %c0_1 = arith.constant 0 : index
    %3 = vector.load %arg6[%c0, %c0_1] : memref<8x128xf32, #tpu.memory_space<vmem>>, vector<8x128xf32>
    %c0_2 = arith.constant 0 : index
    %c0_3 = arith.constant 0 : index
    %4 = vector.load %arg3[%c0_2, %c0_3] : memref<8x128xbf16, #tpu.memory_space<vmem>>, vector<8x128xbf16>
    %c0_4 = arith.constant 0 : index
    %c0_5 = arith.constant 0 : index
    %5 = vector.load %arg4[%c0_4, %c0_5] : memref<128x128xbf16, #tpu.memory_space<vmem>>, vector<128x128xbf16>
    %cst = arith.constant dense<0.000000e+00> : vector<8x128xf32>
    %6 = tpu.matmul %4, %5, %cst {dimension_numbers = #tpu.dot_dimension_numbers<[1], [0], [0], [1], [0, 0, 1, 1], [], []>} : vector<8x128xbf16>, vector<128x128xbf16>, vector<8x128xf32> -> vector<8x128xf32>
    %7 = arith.addf %3, %6 : vector<8x128xf32>
    %c0_6 = arith.constant 0 : index
    %c0_7 = arith.constant 0 : index
    %8 = vector.load %arg6[%c0_6, %c0_7] : memref<8x128xf32, #tpu.memory_space<vmem>>, vector<8x128xf32>
    tpu.vector_store %arg6[%c0_6, %c0_7], %7 {strides = array<i32>} : memref<8x128xf32, #tpu.memory_space<vmem>>, vector<8x128xf32>,
    %c0_i32_8 = arith.constant 0 : i32
    %9 = arith.cmpi eq, %arg2, %c0_i32_8 : i32
    %10 = arith.extui %9 : i1 to i32
    %c0_i32_9 = arith.constant 0 : i32
    %11 = arith.cmpi ne, %10, %c0_i32_9 : i32
    scf.if %11 {
      %c0_10 = arith.constant 0 : index
      %c0_11 = arith.constant 0 : index
      %12 = vector.load %arg6[%c0_10, %c0_11] : memref<8x128xf32, #tpu.memory_space<vmem>>, vector<8x128xf32>
      %c0_12 = arith.constant 0 : index
      %c0_13 = arith.constant 0 : index
      %13 = vector.load %arg5[%c0_12, %c0_13] : memref<1x128xf32, #tpu.memory_space<vmem>>, vector<1x128xf32>
      %14 = vector.broadcast %13 : vector<1x128xf32> to vector<8x128xf32>
      %15 = arith.addf %12, %14 : vector<8x128xf32>
      %16 = arith.negf %15 : vector<8x128xf32>
      %17 = math.exp %16 : vector<8x128xf32>
      %cst_14 = arith.constant 1.000000e+00 : f32
      %18 = vector.broadcast %cst_14 : f32 to vector<8x128xf32>
      %19 = arith.addf %18, %17 : vector<8x128xf32>
      %20 = arith.divf %18, %19 : vector<8x128xf32>
      %c0_15 = arith.constant 0 : index
      %c0_16 = arith.constant 0 : index
      %21 = vector.load %arg6[%c0_15, %c0_16] : memref<8x128xf32, #tpu.memory_space<vmem>>, vector<8x128xf32>
      tpu.vector_store %arg6[%c0_15, %c0_16], %20 {strides = array<i32>} : memref<8x128xf32, #tpu.memory_space<vmem>>, vector<8x128xf32>,
    } else {
    }
    return
  }
  func.func @transform_0(%arg0: i32, %arg1: i32, %arg2: i32) -> (i32, i32) {
    %c0_i32 = arith.constant 0 : i32
    return %arg0, %arg2 : i32, i32
  }
  func.func @transform_1(%arg0: i32, %arg1: i32, %arg2: i32) -> (i32, i32) {
    %c0_i32 = arith.constant 0 : i32
    return %arg2, %arg1 : i32, i32
  }
  func.func @transform_2(%arg0: i32, %arg1: i32, %arg2: i32) -> (i32, i32) {
    %c0_i32 = arith.constant 0 : i32
    %c0_i32_0 = arith.constant 0 : i32
    return %c0_i32, %arg1 : i32, i32
  }
  func.func @transform_3(%arg0: i32, %arg1: i32, %arg2: i32) -> (i32, i32) {
    %c0_i32 = arith.constant 0 : i32
    return %arg0, %arg1 : i32, i32
  }
}

</mosaic_0001>

<bundles_post_ra>
// kernel: tpu_custom_call.1
= control target key start
LH: loop header
LB: loop body
LE: loop exit
PB: predicated region body
PF: predicated region fallthrough
CT: control target
= control target key end

     0   :  { %8 = vsyncpa [#allocation3], 0  ;;  %s393_s0 = inlined_call_operand.hbm [shape: bf16[8,128], index: 0, kind: input, shape index: {}]   ;;  %s394_s1 = inlined_call_operand.hbm [shape: bf16[128,128], index: 1, kind: input, shape index: {}]   ;;  %s395_s2 = inlined_call_operand.vmem [shape: f32[1,128], index: 2, kind: input, shape index: {}]   ;;  %s396_s3 = inlined_call_operand.hbm [shape: f32[8,128], index: 3, kind: output, shape index: {}]  }
   0x1   :  { %9 = vsyncpa [#allocation6], 0 }
   0x2   :  { %10 = vsyncpa [#allocation4], 0  ;;  %s320_s12 = smov [#allocation2]   ;;  %s321_s14 = smov [#allocation5]  }
   0x3   :  { %s17_s13 = sshll.u32 %s320_s12, 4  ;;  %s26_s15 = sshll.u32 %s321_s14, 4  ;;  %s18_s13 = int_to_ptr.vmem [resolvable:$true] %s17_s13  ;;  %s347_s15 = int_to_ptr.vmem [resolvable:$true] %s26_s15 }
   0x4   :  { %s248_s18 = scalar_lea.hbm %s393_s0, 64 }
   0x5   :  { %p249_p0 = scmp.ne.s32.totalorder %s393_s0, %s248_s18  ;;  %p252_p1 = scmp.lt.u32.totalorder %s248_s18, %s393_s0 }
   0x7   :  { %p254_p2 = pnand %p252_p1, %p249_p0 }
   0x9   :  { %257 = shalt.err (!%p254_p2)
}
   0xa   :  { %s258_s23 = scalar_lea.vmem %s18_s13, 64  ;;  %p263_p4 = scmp.lt.s32.totalorder %s18_s13, %s18_s13 }
   0xb   :  { %p259_p3 = scmp.ne.s32.totalorder %s18_s13, %s258_s23  ;;  %p264_p5 = scmp.lt.s32.totalorder %s258_s23, %s258_s23 }
   0xd   :  { %p265_p6 = por %p264_p5, %p263_p4 }
   0xf   :  { %p266_p7 = pnand %p265_p6, %p259_p3 }
  0x11   :  { %269 = shalt.err (!%p266_p7)
}
  0x12   :  { %20 = dma.hbm_to_vmem [thread:$0]  %s393_s0, 64, %s18_s13, [#allocation3]  }
  0x13   :  { %s270_s28 = scalar_lea.hbm %s394_s1, 1024 }
  0x14   :  { %p271_p8 = scmp.ne.s32.totalorder %s394_s1, %s270_s28  ;;  %p274_p9 = scmp.lt.u32.totalorder %s270_s28, %s394_s1 }
  0x16   :  { %p276_p10 = pnand %p274_p9, %p271_p8 }
  0x18   :  { %279 = shalt.err (!%p276_p10)
}
  0x19   :  { %s280_s6 = scalar_lea.vmem %s347_s15, 1024  ;;  %p285_p12 = scmp.lt.s32.totalorder %s347_s15, %s347_s15 }
  0x1a   :  { %p281_p11 = scmp.ne.s32.totalorder %s347_s15, %s280_s6  ;;  %p286_p13 = scmp.lt.s32.totalorder %s280_s6, %s280_s6 }
  0x1c   :  { %p287_p0 = por %p286_p13, %p285_p12 }
  0x1e   :  { %p288_p1 = pnand %p287_p0, %p281_p11 }
  0x20   :  { %291 = shalt.err (!%p288_p1)
}
  0x21   :  { %s322_s0 = smov 64   ;;  %s323_s7 = smov 4  }
  0x22   :  { %32 = dma.hbm_to_vmem [thread:$0]  %s394_s1, 1024, %s347_s15, [#allocation6], %s322_s0, %s322_s0, %s323_s7  }
  0x23   :  { %314 = dma.done.wait [#allocation3], 64  }
  0x24   :  { %315 = vsyncadd [#allocation3], 4294967232 }
  0x25   :  { %316 = dma.done.wait [#allocation6], 1024  }
  0x26   :  { %317 = vsyncadd [#allocation6], 4294966272  ;;  %v324_v0 = vmov 0.0   ;;  %vm325_vm0 = vmmov 0   ;;  %v236_v1 = vld [vmem:[#allocation5] sm:$0xff]   ;;  %v237_v2 = vld [vmem:[#allocation5 + $0x8] sm:$0xff]  }
  0x27   :  { %209 = vmatprep.subr.bf16.mxu0 %v324_v0  ;;  %225 = vmatprep.mubr.msk.bf16.mxu0 %vm325_vm0, %v324_v0  ;;  %v238_v3 = vld [vmem:[#allocation5 + $0x10] sm:$0xff]   ;;  %v239_v4 = vld [vmem:[#allocation5 + $0x18] sm:$0xff]   ;;  %v240_v5 = vld [vmem:[#allocation5 + $0x20] sm:$0xff]   ;;  %s326_s11 = smov [#allocation7]  }
  0x28   :  { %210 = vmatpush3.bf16.msra.mxu0 %v236_v1  ;;  %v241_v6 = vld [vmem:[#allocation5 + $0x28] sm:$0xff]   ;;  %v242_v7 = vld [vmem:[#allocation5 + $0x30] sm:$0xff]   ;;  %v243_v8 = vld [vmem:[#allocation5 + $0x38] sm:$0xff]   ;;  %s180_s12 = sshll.u32 %s326_s11, 4  ;;  %s181_s12 = int_to_ptr.vmem [resolvable:$true] %s180_s12 }
  0x29   :  { %211 = vmatprep.subr.bf16.mxu0 %v324_v0  ;;  %v48_v9 = vld [vmem:[#allocation2] sm:$0xf]  ;;  %s292_s13 = scalar_lea.vmem %s181_s12, 128  ;;  %p297_p3 = scmp.lt.s32.totalorder %s181_s12, %s181_s12 }
  0x2a   :  { %v198_v11 = vld [vmem:[%s395_s2] ss:$0 sm:$0xff]  ;;  %p293_p2 = scmp.ne.s32.totalorder %s181_s12, %s292_s13  ;;  %p298_p4 = scmp.lt.s32.totalorder %s292_s13, %s292_s13 }
  0x2c   :  { %212 = vmatpush3.bf16.msra.mxu0 %v237_v2  ;;  %p299_p5 = por %p298_p4, %p297_p3 }
  0x2d   :  { %213 = vmatprep.subr.bf16.mxu0 %v324_v0 }
  0x2e   :  { %p300_p6 = pnand %p299_p5, %p293_p2 }
  0x30   :  { %214 = vmatpush3.bf16.msra.mxu0 %v238_v3 }
  0x31   :  { %215 = vmatprep.subr.bf16.mxu0 %v324_v0 }
  0x34   :  { %216 = vmatpush3.bf16.msra.mxu0 %v239_v4 }
  0x35   :  { %217 = vmatprep.subr.bf16.mxu0 %v324_v0 }
  0x38   :  { %218 = vmatpush3.bf16.msra.mxu0 %v240_v5 }
  0x39   :  { %219 = vmatprep.subr.bf16.mxu0 %v324_v0 }
  0x3c   :  { %220 = vmatpush3.bf16.msra.mxu0 %v241_v6 }
  0x3d   :  { %221 = vmatprep.subr.bf16.mxu0 %v324_v0 }
  0x40   :  { %222 = vmatpush3.bf16.msra.mxu0 %v242_v7 }
  0x41   :  { %223 = vmatprep.subr.bf16.mxu0 %v324_v0 }
  0x44   :  { %224 = vmatpush3.bf16.msra.mxu0 %v243_v8 }
  0x47   :  { %226 = vmatmul.mubr.bf16.vlgmr.msra.gmra.mrb[0].mxu0 %v48_v9 }
 0x11a   :  { %v147_v10 = vpop.f32.mrb[0].mxu0 }
 0x11b   :  { %v227_v12 = vpop.f32.mrb[1].mxu0  ;;  %v166_v15 = vadd.f32 %v198_v11, %v147_v10 }
 0x11c   :  { %v150_v13 = vpop.f32.mrb[2].mxu0 }
 0x11d   :  { %v228_v14 = vpop.f32.mrb[3].mxu0  ;;  %v199_v16 = vmul.f32 -1.442695, %v166_v15 }
 0x11f   :  { %244 = vpow2.f32 %v199_v16 }
 0x129   :  { %v245_v17 = vpop.eup %244 }
 0x12a   :  { %v170_v18 = vadd.f32 1.0, %v245_v17 }
 0x12c   :  { %246 = vrcp.f32 %v170_v18 }
 0x136   :  { %v247_v19 = vpop.eup %246 }
 0x137   :  { %173 = vst [vmem:[#allocation7] sm:$0xff] %v247_v19 }
 0x138   :  { %303 = shalt.err (!%p300_p6)
}
 0x139   :  { %s304_s15 = scalar_lea.hbm %s396_s3, 128 }
 0x13a   :  { %p305_p7 = scmp.ne.s32.totalorder %s396_s3, %s304_s15  ;;  %p308_p8 = scmp.lt.u32.totalorder %s304_s15, %s396_s3 }
 0x13c   :  { %p310_p9 = pnand %p308_p8, %p305_p7 }
 0x13e   :  { %313 = shalt.err (!%p310_p9)
}
 0x13f   :  { %183 = dma.vmem_to_hbm [thread:$0]  %s181_s12, 128, %s396_s3, [#allocation4]  }
 0x140   :  { %318 = dma.done.wait [#allocation4], 128  }
 0x141   :  { %319 = vsyncadd [#allocation4], 4294967168 }
 0x142   :  { %187 = vsyncpa [#allocation3], 1 }
 0x143   :  { %188 = vsyncpa [#allocation6], 1 }
 0x144   :  { %189 = vsyncpa [#allocation4], 1 }

</bundles_post_ra>
